<compile_context>
chip_gen: v7x
topology: tpu7x:2x2x1
jax: 0.10.0
libtpu: 0.0.40
codegen_flags: <defaults>
</compile_context>

<pallas_src>
import jax
import jax.numpy as jnp
from jax.experimental import pallas as pl
from jax.experimental.pallas import tpu as pltpu


def _triple_conv_kernel(x_ref, w_ref, b_ref, o_ref):
    """One (C, TS) spatial tile of the fused TripleConv forward.

    x_ref : (C, TS) VMEM tile — channels on sublanes, spatial on lanes.
    w_ref : (3*C*C,) SMEM — BN/bias-folded weights, block-major then row-major.
    b_ref : (3*C,)   SMEM — BN/bias-folded biases.
    o_ref : (C, TS)  VMEM output tile.
    """
    C, _ = x_ref.shape

    # Load the identity once: one lane-dense (1, TS) row per channel.
    x_rows = [x_ref[c:c + 1, :] for c in range(C)]

    def conv_relu(rows, k):
        wbase = k * C * C
        bbase = k * C
        out_rows = []
        for co in range(C):
            acc = w_ref[wbase + co * C] * rows[0]
            for ci in range(1, C):
                acc = acc + w_ref[wbase + co * C + ci] * rows[ci]
            acc = acc + b_ref[bbase + co]
            out_rows.append(jnp.maximum(acc, 0.0))
        return out_rows

    h = conv_relu(x_rows, 0)
    h = [a + b for a, b in zip(h, x_rows)]      # out += identity
    h = conv_relu(h, 1)
    h = [a + b for a, b in zip(h, x_rows)]      # out += identity
    h = conv_relu(h, 2)

    for co in range(C):
        o_ref[co:co + 1, :] = h[co].astype(o_ref.dtype)


def triple_conv_pallas(x_nchw, params, *, spatial_tile=2048):
    """TripleConv forward. x_nchw: (N, C, H, W) float32."""
    N, C, H, W = x_nchw.shape
    do_bn = (H > 1) and (W > 1)          # mirrors the torch forward (static shapes)
    eps = 1e-5                           # nn.BatchNorm2d default
    HW = H * W

    # Free view: NCHW -> (N, C, H*W). Spatial goes on the lane dimension.
    x3d = x_nchw.reshape(N, C, HW)

    # Fold conv bias + inference-mode BN affine into the weights (host side).
    w_chunks, b_chunks = [], []
    for i in (1, 2, 3):
        p = params[f"block{i}"]
        w = p["w"].reshape(C, C)                    # (Cout, Cin)
        b = p["b"]
        if do_bn:
            s = p["gamma"] / jnp.sqrt(p["var"] + eps)
            t = p["beta"] - p["mean"] * s
            w = w * s[:, None]
            b = b * s + t
        w_chunks.append(w.reshape(-1))
        b_chunks.append(b.reshape(-1))
    w_flat = jnp.concatenate(w_chunks).astype(jnp.float32)   # (3*C*C,)
    b_flat = jnp.concatenate(b_chunks).astype(jnp.float32)   # (3*C,)

    # Spatial tile: full H*W when small, else 2048 lanes (multiple of 128).
    TS = min(HW, spatial_tile)
    grid = (N, pl.cdiv(HW, TS))

    tile_spec = pl.BlockSpec((None, C, TS), lambda n, s: (n, 0, s))
    smem_spec = pl.BlockSpec(memory_space=pltpu.MemorySpace.SMEM)

    out3d = pl.pallas_call(
        _triple_conv_kernel,
        out_shape=jax.ShapeDtypeStruct((N, C, HW), x_nchw.dtype),
        grid_spec=pltpu.PrefetchScalarGridSpec(
            num_scalar_prefetch=0,
            grid=grid,
            in_specs=[tile_spec, smem_spec, smem_spec],
            out_specs=tile_spec,
        ),
        compiler_params=pltpu.CompilerParams(
            dimension_semantics=("parallel", "parallel")),
    )(x3d, w_flat, b_flat)

    return out3d.reshape(N, C, H, W)


def triple_conv_reference(x_nchw, params):
    """Pure-JAX reference of the same (inference-mode BN) forward."""
    N, C, H, W = x_nchw.shape
    do_bn = (H > 1) and (W > 1)
    eps = 1e-5
    x = x_nchw.reshape(N, C, H * W)

    def block(inp, p):
        w = p["w"].reshape(C, C)
        z = jnp.einsum("oc,ncs->nos", w, inp) + p["b"][None, :, None]
        if do_bn:
            z = (z - p["mean"][None, :, None]) / jnp.sqrt(p["var"][None, :, None] + eps)
            z = z * p["gamma"][None, :, None] + p["beta"][None, :, None]
        return jnp.maximum(z, 0.0)

    out = block(x, params["block1"]) + x
    out = block(out, params["block2"]) + x
    out = block(out, params["block3"])
    return out.reshape(N, C, H, W)


def make_params(key, C):
    params = {}
    for i in (1, 2, 3):
        key, kw, kb, kg, kbe, km, kv = jax.random.split(key, 7)
        params[f"block{i}"] = {
            "w": jax.random.normal(kw, (C, C, 1, 1), jnp.float32) * 0.3,
            "b": jax.random.normal(kb, (C,), jnp.float32) * 0.1,
            "gamma": 1.0 + 0.1 * jax.random.normal(kg, (C,), jnp.float32),
            "beta": 0.1 * jax.random.normal(kbe, (C,), jnp.float32),
            "mean": 0.05 * jax.random.normal(km, (C,), jnp.float32),
            "var": 1.0 + 0.1 * jax.nn.softplus(jax.random.normal(kv, (C,), jnp.float32)),
        }
    return params


if __name__ == "__main__":
    key = jax.random.PRNGKey(0)
    key, kx = jax.random.split(key)
    N, C, H, W = 2, 4, 16, 16
    x = jax.random.normal(kx, (N, C, H, W), jnp.float32)
    params = make_params(key, C)

    out = jax.block_until_ready(triple_conv_pallas(x, params))
    ref = triple_conv_reference(x, params)

    assert out.shape == (N, C, H, W)
    assert jnp.allclose(out, ref, atol=2e-5, rtol=2e-5), (
        float(jnp.max(jnp.abs(out - ref))))
    print("KERNEL_OK")
</pallas_src>

<mosaic_0001>
module attributes {stable_mosaic.version = 11 : i64} {
  func.func @_triple_conv_kernel(%arg0: i32, %arg1: i32, %arg2: memref<1x4x256xf32, #tpu.memory_space<vmem>>, %arg3: memref<48xf32, #tpu.memory_space<smem>>, %arg4: memref<12xf32, #tpu.memory_space<smem>>, %arg5: memref<1x4x256xf32, #tpu.memory_space<vmem>>) attributes {dimension_semantics = [#tpu.dimension_semantics<parallel>, #tpu.dimension_semantics<parallel>], iteration_bounds = array<i64: 2, 1>, scalar_prefetch = 0 : i64, scratch_operands = 0 : i64, tpu.core_type = #tpu.core_type<tc>, window_params = [{transform_indices = @transform_0, window_bounds = array<i64: 1, 4, 256>}, {transform_indices = @transform_1, window_bounds = array<i64: 48>}, {transform_indices = @transform_2, window_bounds = array<i64: 12>}, {transform_indices = @transform_3, window_bounds = array<i64: 1, 4, 256>}]} {
    %c0 = arith.constant 0 : index
    %c0_0 = arith.constant 0 : index
    %c0_1 = arith.constant 0 : index
    %0 = vector.load %arg2[%c0, %c0_0, %c0_1] : memref<1x4x256xf32, #tpu.memory_space<vmem>>, vector<1x1x256xf32>
    %1 = vector.shape_cast %0 : vector<1x1x256xf32> to vector<1x256xf32>
    %c0_2 = arith.constant 0 : index
    %c1 = arith.constant 1 : index
    %c0_3 = arith.constant 0 : index
    %2 = vector.load %arg2[%c0_2, %c1, %c0_3] : memref<1x4x256xf32, #tpu.memory_space<vmem>>, vector<1x1x256xf32>
    %3 = vector.shape_cast %2 : vector<1x1x256xf32> to vector<1x256xf32>
    %c0_4 = arith.constant 0 : index
    %c2 = arith.constant 2 : index
    %c0_5 = arith.constant 0 : index
    %4 = vector.load %arg2[%c0_4, %c2, %c0_5] : memref<1x4x256xf32, #tpu.memory_space<vmem>>, vector<1x1x256xf32>
    %5 = vector.shape_cast %4 : vector<1x1x256xf32> to vector<1x256xf32>
    %c0_6 = arith.constant 0 : index
    %c3 = arith.constant 3 : index
    %c0_7 = arith.constant 0 : index
    %6 = vector.load %arg2[%c0_6, %c3, %c0_7] : memref<1x4x256xf32, #tpu.memory_space<vmem>>, vector<1x1x256xf32>
    %7 = vector.shape_cast %6 : vector<1x1x256xf32> to vector<1x256xf32>
    %c0_8 = arith.constant 0 : index
    %8 = memref.load %arg3[%c0_8] : memref<48xf32, #tpu.memory_space<smem>>
    %9 = vector.broadcast %8 : f32 to vector<1x256xf32>
    %10 = arith.mulf %9, %1 : vector<1x256xf32>
    %c1_9 = arith.constant 1 : index
    %11 = memref.load %arg3[%c1_9] : memref<48xf32, #tpu.memory_space<smem>>
    %12 = vector.broadcast %11 : f32 to vector<1x256xf32>
    %13 = arith.mulf %12, %3 : vector<1x256xf32>
    %14 = arith.addf %10, %13 : vector<1x256xf32>
    %c2_10 = arith.constant 2 : index
    %15 = memref.load %arg3[%c2_10] : memref<48xf32, #tpu.memory_space<smem>>
    %16 = vector.broadcast %15 : f32 to vector<1x256xf32>
    %17 = arith.mulf %16, %5 : vector<1x256xf32>
    %18 = arith.addf %14, %17 : vector<1x256xf32>
    %c3_11 = arith.constant 3 : index
    %19 = memref.load %arg3[%c3_11] : memref<48xf32, #tpu.memory_space<smem>>
    %20 = vector.broadcast %19 : f32 to vector<1x256xf32>
    %21 = arith.mulf %20, %7 : vector<1x256xf32>
    %22 = arith.addf %18, %21 : vector<1x256xf32>
    %c0_12 = arith.constant 0 : index
    %23 = memref.load %arg4[%c0_12] : memref<12xf32, #tpu.memory_space<smem>>
    %24 = vector.broadcast %23 : f32 to vector<1x256xf32>
    %25 = arith.addf %22, %24 : vector<1x256xf32>
    %cst = arith.constant 0.000000e+00 : f32
    %26 = vector.broadcast %cst : f32 to vector<1x256xf32>
    %27 = arith.maximumf %25, %26 : vector<1x256xf32>
    %c4 = arith.constant 4 : index
    %28 = memref.load %arg3[%c4] : memref<48xf32, #tpu.memory_space<smem>>
    %29 = vector.broadcast %28 : f32 to vector<1x256xf32>
    %30 = arith.mulf %29, %1 : vector<1x256xf32>
    %c5 = arith.constant 5 : index
    %31 = memref.load %arg3[%c5] : memref<48xf32, #tpu.memory_space<smem>>
    %32 = vector.broadcast %31 : f32 to vector<1x256xf32>
    %33 = arith.mulf %32, %3 : vector<1x256xf32>
    %34 = arith.addf %30, %33 : vector<1x256xf32>
    %c6 = arith.constant 6 : index
    %35 = memref.load %arg3[%c6] : memref<48xf32, #tpu.memory_space<smem>>
    %36 = vector.broadcast %35 : f32 to vector<1x256xf32>
    %37 = arith.mulf %36, %5 : vector<1x256xf32>
    %38 = arith.addf %34, %37 : vector<1x256xf32>
    %c7 = arith.constant 7 : index
    %39 = memref.load %arg3[%c7] : memref<48xf32, #tpu.memory_space<smem>>
    %40 = vector.broadcast %39 : f32 to vector<1x256xf32>
    %41 = arith.mulf %40, %7 : vector<1x256xf32>
    %42 = arith.addf %38, %41 : vector<1x256xf32>
    %c1_13 = arith.constant 1 : index
    %43 = memref.load %arg4[%c1_13] : memref<12xf32, #tpu.memory_space<smem>>
    %44 = vector.broadcast %43 : f32 to vector<1x256xf32>
    %45 = arith.addf %42, %44 : vector<1x256xf32>
    %cst_14 = arith.constant 0.000000e+00 : f32
    %46 = vector.broadcast %cst_14 : f32 to vector<1x256xf32>
    %47 = arith.maximumf %45, %46 : vector<1x256xf32>
    %c8 = arith.constant 8 : index
    %48 = memref.load %arg3[%c8] : memref<48xf32, #tpu.memory_space<smem>>
    %49 = vector.broadcast %48 : f32 to vector<1x256xf32>
    %50 = arith.mulf %49, %1 : vector<1x256xf32>
    %c9 = arith.constant 9 : index
    %51 = memref.load %arg3[%c9] : memref<48xf32, #tpu.memory_space<smem>>
    %52 = vector.broadcast %51 : f32 to vector<1x256xf32>
    %53 = arith.mulf %52, %3 : vector<1x256xf32>
    %54 = arith.addf %50, %53 : vector<1x256xf32>
    %c10 = arith.constant 10 : index
    %55 = memref.load %arg3[%c10] : memref<48xf32, #tpu.memory_space<smem>>
    %56 = vector.broadcast %55 : f32 to vector<1x256xf32>
    %57 = arith.mulf %56, %5 : vector<1x256xf32>
    %58 = arith.addf %54, %57 : vector<1x256xf32>
    %c11 = arith.constant 11 : index
    %59 = memref.load %arg3[%c11] : memref<48xf32, #tpu.memory_space<smem>>
    %60 = vector.broadcast %59 : f32 to vector<1x256xf32>
    %61 = arith.mulf %60, %7 : vector<1x256xf32>
    %62 = arith.addf %58, %61 : vector<1x256xf32>
    %c2_15 = arith.constant 2 : index
    %63 = memref.load %arg4[%c2_15] : memref<12xf32, #tpu.memory_space<smem>>
    %64 = vector.broadcast %63 : f32 to vector<1x256xf32>
    %65 = arith.addf %62, %64 : vector<1x256xf32>
    %cst_16 = arith.constant 0.000000e+00 : f32
    %66 = vector.broadcast %cst_16 : f32 to vector<1x256xf32>
    %67 = arith.maximumf %65, %66 : vector<1x256xf32>
    %c12 = arith.constant 12 : index
    %68 = memref.load %arg3[%c12] : memref<48xf32, #tpu.memory_space<smem>>
    %69 = vector.broadcast %68 : f32 to vector<1x256xf32>
    %70 = arith.mulf %69, %1 : vector<1x256xf32>
    %c13 = arith.constant 13 : index
    %71 = memref.load %arg3[%c13] : memref<48xf32, #tpu.memory_space<smem>>
    %72 = vector.broadcast %71 : f32 to vector<1x256xf32>
    %73 = arith.mulf %72, %3 : vector<1x256xf32>
    %74 = arith.addf %70, %73 : vector<1x256xf32>
    %c14 = arith.constant 14 : index
    %75 = memref.load %arg3[%c14] : memref<48xf32, #tpu.memory_space<smem>>
    %76 = vector.broadcast %75 : f32 to vector<1x256xf32>
    %77 = arith.mulf %76, %5 : vector<1x256xf32>
    %78 = arith.addf %74, %77 : vector<1x256xf32>
    %c15 = arith.constant 15 : index
    %79 = memref.load %arg3[%c15] : memref<48xf32, #tpu.memory_space<smem>>
    %80 = vector.broadcast %79 : f32 to vector<1x256xf32>
    %81 = arith.mulf %80, %7 : vector<1x256xf32>
    %82 = arith.addf %78, %81 : vector<1x256xf32>
    %c3_17 = arith.constant 3 : index
    %83 = memref.load %arg4[%c3_17] : memref<12xf32, #tpu.memory_space<smem>>
    %84 = vector.broadcast %83 : f32 to vector<1x256xf32>
    %85 = arith.addf %82, %84 : vector<1x256xf32>
    %cst_18 = arith.constant 0.000000e+00 : f32
    %86 = vector.broadcast %cst_18 : f32 to vector<1x256xf32>
    %87 = arith.maximumf %85, %86 : vector<1x256xf32>
    %88 = arith.addf %27, %1 : vector<1x256xf32>
    %89 = arith.addf %47, %3 : vector<1x256xf32>
    %90 = arith.addf %67, %5 : vector<1x256xf32>
    %91 = arith.addf %87, %7 : vector<1x256xf32>
    %c16 = arith.constant 16 : index
    %92 = memref.load %arg3[%c16] : memref<48xf32, #tpu.memory_space<smem>>
    %93 = vector.broadcast %92 : f32 to vector<1x256xf32>
    %94 = arith.mulf %93, %88 : vector<1x256xf32>
    %c17 = arith.constant 17 : index
    %95 = memref.load %arg3[%c17] : memref<48xf32, #tpu.memory_space<smem>>
    %96 = vector.broadcast %95 : f32 to vector<1x256xf32>
    %97 = arith.mulf %96, %89 : vector<1x256xf32>
    %98 = arith.addf %94, %97 : vector<1x256xf32>
    %c18 = arith.constant 18 : index
    %99 = memref.load %arg3[%c18] : memref<48xf32, #tpu.memory_space<smem>>
    %100 = vector.broadcast %99 : f32 to vector<1x256xf32>
    %101 = arith.mulf %100, %90 : vector<1x256xf32>
    %102 = arith.addf %98, %101 : vector<1x256xf32>
    %c19 = arith.constant 19 : index
    %103 = memref.load %arg3[%c19] : memref<48xf32, #tpu.memory_space<smem>>
    %104 = vector.broadcast %103 : f32 to vector<1x256xf32>
    %105 = arith.mulf %104, %91 : vector<1x256xf32>
    %106 = arith.addf %102, %105 : vector<1x256xf32>
    %c4_19 = arith.constant 4 : index
    %107 = memref.load %arg4[%c4_19] : memref<12xf32, #tpu.memory_space<smem>>
    %108 = vector.broadcast %107 : f32 to vector<1x256xf32>
    %109 = arith.addf %106, %108 : vector<1x256xf32>
    %cst_20 = arith.constant 0.000000e+00 : f32
    %110 = vector.broadcast %cst_20 : f32 to vector<1x256xf32>
    %111 = arith.maximumf %109, %110 : vector<1x256xf32>
    %c20 = arith.constant 20 : index
    %112 = memref.load %arg3[%c20] : memref<48xf32, #tpu.memory_space<smem>>
    %113 = vector.broadcast %112 : f32 to vector<1x256xf32>
    %114 = arith.mulf %113, %88 : vector<1x256xf32>
    %c21 = arith.constant 21 : index
    %115 = memref.load %arg3[%c21] : memref<48xf32, #tpu.memory_space<smem>>
    %116 = vector.broadcast %115 : f32 to vector<1x256xf32>
    %117 = arith.mulf %116, %89 : vector<1x256xf32>
    %118 = arith.addf %114, %117 : vector<1x256xf32>
    %c22 = arith.constant 22 : index
    %119 = memref.load %arg3[%c22] : memref<48xf32, #tpu.memory_space<smem>>
    %120 = vector.broadcast %119 : f32 to vector<1x256xf32>
    %121 = arith.mulf %120, %90 : vector<1x256xf32>
    %122 = arith.addf %118, %121 : vector<1x256xf32>
    %c23 = arith.constant 23 : index
    %123 = memref.load %arg3[%c23] : memref<48xf32, #tpu.memory_space<smem>>
    %124 = vector.broadcast %123 : f32 to vector<1x256xf32>
    %125 = arith.mulf %124, %91 : vector<1x256xf32>
    %126 = arith.addf %122, %125 : vector<1x256xf32>
    %c5_21 = arith.constant 5 : index
    %127 = memref.load %arg4[%c5_21] : memref<12xf32, #tpu.memory_space<smem>>
    %128 = vector.broadcast %127 : f32 to vector<1x256xf32>
    %129 = arith.addf %126, %128 : vector<1x256xf32>
    %cst_22 = arith.constant 0.000000e+00 : f32
    %130 = vector.broadcast %cst_22 : f32 to vector<1x256xf32>
    %131 = arith.maximumf %129, %130 : vector<1x256xf32>
    %c24 = arith.constant 24 : index
    %132 = memref.load %arg3[%c24] : memref<48xf32, #tpu.memory_space<smem>>
    %133 = vector.broadcast %132 : f32 to vector<1x256xf32>
    %134 = arith.mulf %133, %88 : vector<1x256xf32>
    %c25 = arith.constant 25 : index
    %135 = memref.load %arg3[%c25] : memref<48xf32, #tpu.memory_space<smem>>
    %136 = vector.broadcast %135 : f32 to vector<1x256xf32>
    %137 = arith.mulf %136, %89 : vector<1x256xf32>
    %138 = arith.addf %134, %137 : vector<1x256xf32>
    %c26 = arith.constant 26 : index
    %139 = memref.load %arg3[%c26] : memref<48xf32, #tpu.memory_space<smem>>
    %140 = vector.broadcast %139 : f32 to vector<1x256xf32>
    %141 = arith.mulf %140, %90 : vector<1x256xf32>
    %142 = arith.addf %138, %141 : vector<1x256xf32>
    %c27 = arith.constant 27 : index
    %143 = memref.load %arg3[%c27] : memref<48xf32, #tpu.memory_space<smem>>
    %144 = vector.broadcast %143 : f32 to vector<1x256xf32>
    %145 = arith.mulf %144, %91 : vector<1x256xf32>
    %146 = arith.addf %142, %145 : vector<1x256xf32>
    %c6_23 = arith.constant 6 : index
    %147 = memref.load %arg4[%c6_23] : memref<12xf32, #tpu.memory_space<smem>>
    %148 = vector.broadcast %147 : f32 to vector<1x256xf32>
    %149 = arith.addf %146, %148 : vector<1x256xf32>
    %cst_24 = arith.constant 0.000000e+00 : f32
    %150 = vector.broadcast %cst_24 : f32 to vector<1x256xf32>
    %151 = arith.maximumf %149, %150 : vector<1x256xf32>
    %c28 = arith.constant 28 : index
    %152 = memref.load %arg3[%c28] : memref<48xf32, #tpu.memory_space<smem>>
    %153 = vector.broadcast %152 : f32 to vector<1x256xf32>
    %154 = arith.mulf %153, %88 : vector<1x256xf32>
    %c29 = arith.constant 29 : index
    %155 = memref.load %arg3[%c29] : memref<48xf32, #tpu.memory_space<smem>>
    %156 = vector.broadcast %155 : f32 to vector<1x256xf32>
    %157 = arith.mulf %156, %89 : vector<1x256xf32>
    %158 = arith.addf %154, %157 : vector<1x256xf32>
    %c30 = arith.constant 30 : index
    %159 = memref.load %arg3[%c30] : memref<48xf32, #tpu.memory_space<smem>>
    %160 = vector.broadcast %159 : f32 to vector<1x256xf32>
    %161 = arith.mulf %160, %90 : vector<1x256xf32>
    %162 = arith.addf %158, %161 : vector<1x256xf32>
    %c31 = arith.constant 31 : index
    %163 = memref.load %arg3[%c31] : memref<48xf32, #tpu.memory_space<smem>>
    %164 = vector.broadcast %163 : f32 to vector<1x256xf32>
    %165 = arith.mulf %164, %91 : vector<1x256xf32>
    %166 = arith.addf %162, %165 : vector<1x256xf32>
    %c7_25 = arith.constant 7 : index
    %167 = memref.load %arg4[%c7_25] : memref<12xf32, #tpu.memory_space<smem>>
    %168 = vector.broadcast %167 : f32 to vector<1x256xf32>
    %169 = arith.addf %166, %168 : vector<1x256xf32>
    %cst_26 = arith.constant 0.000000e+00 : f32
    %170 = vector.broadcast %cst_26 : f32 to vector<1x256xf32>
    %171 = arith.maximumf %169, %170 : vector<1x256xf32>
    %172 = arith.addf %111, %1 : vector<1x256xf32>
    %173 = arith.addf %131, %3 : vector<1x256xf32>
    %174 = arith.addf %151, %5 : vector<1x256xf32>
    %175 = arith.addf %171, %7 : vector<1x256xf32>
    %c32 = arith.constant 32 : index
    %176 = memref.load %arg3[%c32] : memref<48xf32, #tpu.memory_space<smem>>
    %177 = vector.broadcast %176 : f32 to vector<1x256xf32>
    %178 = arith.mulf %177, %172 : vector<1x256xf32>
    %c33 = arith.constant 33 : index
    %179 = memref.load %arg3[%c33] : memref<48xf32, #tpu.memory_space<smem>>
    %180 = vector.broadcast %179 : f32 to vector<1x256xf32>
    %181 = arith.mulf %180, %173 : vector<1x256xf32>
    %182 = arith.addf %178, %181 : vector<1x256xf32>
    %c34 = arith.constant 34 : index
    %183 = memref.load %arg3[%c34] : memref<48xf32, #tpu.memory_space<smem>>
    %184 = vector.broadcast %183 : f32 to vector<1x256xf32>
    %185 = arith.mulf %184, %174 : vector<1x256xf32>
    %186 = arith.addf %182, %185 : vector<1x256xf32>
    %c35 = arith.constant 35 : index
    %187 = memref.load %arg3[%c35] : memref<48xf32, #tpu.memory_space<smem>>
    %188 = vector.broadcast %187 : f32 to vector<1x256xf32>
    %189 = arith.mulf %188, %175 : vector<1x256xf32>
    %190 = arith.addf %186, %189 : vector<1x256xf32>
    %c8_27 = arith.constant 8 : index
    %191 = memref.load %arg4[%c8_27] : memref<12xf32, #tpu.memory_space<smem>>
    %192 = vector.broadcast %191 : f32 to vector<1x256xf32>
    %193 = arith.addf %190, %192 : vector<1x256xf32>
    %cst_28 = arith.constant 0.000000e+00 : f32
    %194 = vector.broadcast %cst_28 : f32 to vector<1x256xf32>
    %195 = arith.maximumf %193, %194 : vector<1x256xf32>
    %c36 = arith.constant 36 : index
    %196 = memref.load %arg3[%c36] : memref<48xf32, #tpu.memory_space<smem>>
    %197 = vector.broadcast %196 : f32 to vector<1x256xf32>
    %198 = arith.mulf %197, %172 : vector<1x256xf32>
    %c37 = arith.constant 37 : index
    %199 = memref.load %arg3[%c37] : memref<48xf32, #tpu.memory_space<smem>>
    %200 = vector.broadcast %199 : f32 to vector<1x256xf32>
    %201 = arith.mulf %200, %173 : vector<1x256xf32>
    %202 = arith.addf %198, %201 : vector<1x256xf32>
    %c38 = arith.constant 38 : index
    %203 = memref.load %arg3[%c38] : memref<48xf32, #tpu.memory_space<smem>>
    %204 = vector.broadcast %203 : f32 to vector<1x256xf32>
    %205 = arith.mulf %204, %174 : vector<1x256xf32>
    %206 = arith.addf %202, %205 : vector<1x256xf32>
    %c39 = arith.constant 39 : index
    %207 = memref.load %arg3[%c39] : memref<48xf32, #tpu.memory_space<smem>>
    %208 = vector.broadcast %207 : f32 to vector<1x256xf32>
    %209 = arith.mulf %208, %175 : vector<1x256xf32>
    %210 = arith.addf %206, %209 : vector<1x256xf32>
    %c9_29 = arith.constant 9 : index
    %211 = memref.load %arg4[%c9_29] : memref<12xf32, #tpu.memory_space<smem>>
    %212 = vector.broadcast %211 : f32 to vector<1x256xf32>
    %213 = arith.addf %210, %212 : vector<1x256xf32>
    %cst_30 = arith.constant 0.000000e+00 : f32
    %214 = vector.broadcast %cst_30 : f32 to vector<1x256xf32>
    %215 = arith.maximumf %213, %214 : vector<1x256xf32>
    %c40 = arith.constant 40 : index
    %216 = memref.load %arg3[%c40] : memref<48xf32, #tpu.memory_space<smem>>
    %217 = vector.broadcast %216 : f32 to vector<1x256xf32>
    %218 = arith.mulf %217, %172 : vector<1x256xf32>
    %c41 = arith.constant 41 : index
    %219 = memref.load %arg3[%c41] : memref<48xf32, #tpu.memory_space<smem>>
    %220 = vector.broadcast %219 : f32 to vector<1x256xf32>
    %221 = arith.mulf %220, %173 : vector<1x256xf32>
    %222 = arith.addf %218, %221 : vector<1x256xf32>
    %c42 = arith.constant 42 : index
    %223 = memref.load %arg3[%c42] : memref<48xf32, #tpu.memory_space<smem>>
    %224 = vector.broadcast %223 : f32 to vector<1x256xf32>
    %225 = arith.mulf %224, %174 : vector<1x256xf32>
    %226 = arith.addf %222, %225 : vector<1x256xf32>
    %c43 = arith.constant 43 : index
    %227 = memref.load %arg3[%c43] : memref<48xf32, #tpu.memory_space<smem>>
    %228 = vector.broadcast %227 : f32 to vector<1x256xf32>
    %229 = arith.mulf %228, %175 : vector<1x256xf32>
    %230 = arith.addf %226, %229 : vector<1x256xf32>
    %c10_31 = arith.constant 10 : index
    %231 = memref.load %arg4[%c10_31] : memref<12xf32, #tpu.memory_space<smem>>
    %232 = vector.broadcast %231 : f32 to vector<1x256xf32>
    %233 = arith.addf %230, %232 : vector<1x256xf32>
    %cst_32 = arith.constant 0.000000e+00 : f32
    %234 = vector.broadcast %cst_32 : f32 to vector<1x256xf32>
    %235 = arith.maximumf %233, %234 : vector<1x256xf32>
    %c44 = arith.constant 44 : index
    %236 = memref.load %arg3[%c44] : memref<48xf32, #tpu.memory_space<smem>>
    %237 = vector.broadcast %236 : f32 to vector<1x256xf32>
    %238 = arith.mulf %237, %172 : vector<1x256xf32>
    %c45 = arith.constant 45 : index
    %239 = memref.load %arg3[%c45] : memref<48xf32, #tpu.memory_space<smem>>
    %240 = vector.broadcast %239 : f32 to vector<1x256xf32>
    %241 = arith.mulf %240, %173 : vector<1x256xf32>
    %242 = arith.addf %238, %241 : vector<1x256xf32>
    %c46 = arith.constant 46 : index
    %243 = memref.load %arg3[%c46] : memref<48xf32, #tpu.memory_space<smem>>
    %244 = vector.broadcast %243 : f32 to vector<1x256xf32>
    %245 = arith.mulf %244, %174 : vector<1x256xf32>
    %246 = arith.addf %242, %245 : vector<1x256xf32>
    %c47 = arith.constant 47 : index
    %247 = memref.load %arg3[%c47] : memref<48xf32, #tpu.memory_space<smem>>
    %248 = vector.broadcast %247 : f32 to vector<1x256xf32>
    %249 = arith.mulf %248, %175 : vector<1x256xf32>
    %250 = arith.addf %246, %249 : vector<1x256xf32>
    %c11_33 = arith.constant 11 : index
    %251 = memref.load %arg4[%c11_33] : memref<12xf32, #tpu.memory_space<smem>>
    %252 = vector.broadcast %251 : f32 to vector<1x256xf32>
    %253 = arith.addf %250, %252 : vector<1x256xf32>
    %cst_34 = arith.constant 0.000000e+00 : f32
    %254 = vector.broadcast %cst_34 : f32 to vector<1x256xf32>
    %255 = arith.maximumf %253, %254 : vector<1x256xf32>
    %c0_35 = arith.constant 0 : index
    %c0_36 = arith.constant 0 : index
    %c0_37 = arith.constant 0 : index
    %256 = vector.load %arg5[%c0_35, %c0_36, %c0_37] : memref<1x4x256xf32, #tpu.memory_space<vmem>>, vector<1x1x256xf32>
    %257 = vector.shape_cast %256 : vector<1x1x256xf32> to vector<1x256xf32>
    %258 = vector.shape_cast %195 : vector<1x256xf32> to vector<1x1x256xf32>
    tpu.vector_store %arg5[%c0_35, %c0_36, %c0_37], %258 {strides = array<i32>} : memref<1x4x256xf32, #tpu.memory_space<vmem>>, vector<1x1x256xf32>,
    %c0_38 = arith.constant 0 : index
    %c1_39 = arith.constant 1 : index
    %c0_40 = arith.constant 0 : index
    %259 = vector.load %arg5[%c0_38, %c1_39, %c0_40] : memref<1x4x256xf32, #tpu.memory_space<vmem>>, vector<1x1x256xf32>
    %260 = vector.shape_cast %259 : vector<1x1x256xf32> to vector<1x256xf32>
    %261 = vector.shape_cast %215 : vector<1x256xf32> to vector<1x1x256xf32>
    tpu.vector_store %arg5[%c0_38, %c1_39, %c0_40], %261 {strides = array<i32>} : memref<1x4x256xf32, #tpu.memory_space<vmem>>, vector<1x1x256xf32>,
    %c0_41 = arith.constant 0 : index
    %c2_42 = arith.constant 2 : index
    %c0_43 = arith.constant 0 : index
    %262 = vector.load %arg5[%c0_41, %c2_42, %c0_43] : memref<1x4x256xf32, #tpu.memory_space<vmem>>, vector<1x1x256xf32>
    %263 = vector.shape_cast %262 : vector<1x1x256xf32> to vector<1x256xf32>
    %264 = vector.shape_cast %235 : vector<1x256xf32> to vector<1x1x256xf32>
    tpu.vector_store %arg5[%c0_41, %c2_42, %c0_43], %264 {strides = array<i32>} : memref<1x4x256xf32, #tpu.memory_space<vmem>>, vector<1x1x256xf32>,
    %c0_44 = arith.constant 0 : index
    %c3_45 = arith.constant 3 : index
    %c0_46 = arith.constant 0 : index
    %265 = vector.load %arg5[%c0_44, %c3_45, %c0_46] : memref<1x4x256xf32, #tpu.memory_space<vmem>>, vector<1x1x256xf32>
    %266 = vector.shape_cast %265 : vector<1x1x256xf32> to vector<1x256xf32>
    %267 = vector.shape_cast %255 : vector<1x256xf32> to vector<1x1x256xf32>
    tpu.vector_store %arg5[%c0_44, %c3_45, %c0_46], %267 {strides = array<i32>} : memref<1x4x256xf32, #tpu.memory_space<vmem>>, vector<1x1x256xf32>,
    return
  }
  func.func @transform_0(%arg0: i32, %arg1: i32) -> (i32, i32, i32) {
    %c0_i32 = arith.constant 0 : i32
    %c0_i32_0 = arith.constant 0 : i32
    return %arg0, %c0_i32, %arg1 : i32, i32, i32
  }
  func.func @transform_1(%arg0: i32, %arg1: i32) -> i32 {
    %c0_i32 = arith.constant 0 : i32
    %c0_i32_0 = arith.constant 0 : i32
    return %c0_i32 : i32
  }
  func.func @transform_2(%arg0: i32, %arg1: i32) -> i32 {
    %c0_i32 = arith.constant 0 : i32
    %c0_i32_0 = arith.constant 0 : i32
    return %c0_i32 : i32
  }
  func.func @transform_3(%arg0: i32, %arg1: i32) -> (i32, i32, i32) {
    %c0_i32 = arith.constant 0 : i32
    %c0_i32_0 = arith.constant 0 : i32
    return %arg0, %c0_i32, %arg1 : i32, i32, i32
  }
}

</mosaic_0001>

<bundles_post_ra>
// kernel: tpu_custom_call.1
= control target key start
LH: loop header
LB: loop body
LE: loop exit
PB: predicated region body
PF: predicated region fallthrough
CT: control target
= control target key end

     0   :  { %s1372_s0 = inlined_call_operand.hbm [shape: f32[2,4,256], index: 0, kind: input, shape index: {}]   ;;  %s1373_s1 = inlined_call_operand.vmem [shape: f32[48], index: 1, kind: input, shape index: {}]   ;;  %s1374_s2 = inlined_call_operand.vmem [shape: f32[12], index: 2, kind: input, shape index: {}]   ;;  %s1375_s3 = inlined_call_operand.hbm [shape: f32[2,4,256], index: 3, kind: output, shape index: {}]  }
   0x1   :  { %1381 = sst [smem:[#allocation14_spill]] %s1372_s0 }
   0x2   :  { %1382 = sst [smem:[#allocation15_spill]] %s1373_s1 }
   0x3   :  { %8 = vsyncpa [#allocation3], 0 }
   0x4   :  { %10 = vsyncpa [#allocation3 + $0x1], 0 }
   0x5   :  { %11 = vsyncpa [#allocation5], 0 }
   0x6   :  { %12 = vsyncpa [#allocation8], 0 }
   0x7   :  { %13 = vsyncpa [#allocation4], 0 }
   0x8   :  { %15 = vsyncpa [#allocation4 + $0x1], 0  ;;  %s955_s12 = smov 0   ;;  %s957_s13 = smov 0  }
   0x9   :  { %s959_s14 = smov 0   ;;  %s961_s15 = smov 0  }
   0xa   :  { %s963_s16 = smov 0   ;;  %s965_s17 = smov 0  }
   0xb LB: > { %s611_s18 = sadd.s32 4294967295, %s929_s17   ;;  %s612_s19 = sadd.s32 4294967294, %s929_s17   ;;  %s929_s17 = sphi %s965_s17, %s21_s17   ;;  %s925_s16 = sphi %s963_s16, %s1406_s16   ;;  %s921_s15 = sphi %s961_s15, %s1405_s15   ;;  %s917_s14 = sphi %s959_s14, %s1404_s14   ;;  %s913_s13 = sphi %s957_s13, %s1403_s13   ;;  %s909_s12 = sphi %s955_s12, %s1402_s12  }
   0xc   : > { %p55_p0 = scmp.ne.s32.totalorder %s913_s13, %s909_s12  ;;  %p989_p1 = scmp.eq.s32.totalorder %s611_s18, 0 }
   0xd   : > { %p993_p2 = scmp.eq.s32.totalorder %s611_s18, 1  ;;  %p129_p3 = scmp.eq.s32.totalorder %s612_s19, 1 }
   0xe   : > { %s1383_s20 = scalar_select %p989_p1, 1, 0 }
   0xf   : > { %s1384_s21 = scalar_select %p993_p2, 1, 0 }
  0x10   : > { %p999_p4 = por %p989_p1, %p55_p0  ;;  %p613_p5 = scmp.ge.s32.totalorder %s929_s17, 1 }
  0x11   : > { %p1004_p6 = por %p129_p3, %p55_p0  ;;  %p136_p7 = scmp.lt.s32.totalorder %s929_s17, 3 }
  0x12   : > { %s1385_s22 = scalar_select %p999_p4, 1, 0 }
  0x13   : > { %s1386_s23 = scalar_select %p1004_p6, 1, 0 }
  0x14   : > { %s1387_s1 = sld [smem:[#allocation15_spill]]  ;;  %p1012_p8 = pnand %p613_p5, %p136_p7 }
  0x15   : > { %s160_s30 = sshll.u32 %s1374_s2, 4  ;;  %s161_s30 = int_to_ptr.vmem [resolvable:$true] %s160_s30 }
  0x16   : > { %s1388_s27 = scalar_select %p1012_p8, 1, 0 }
  0x17   : > { %p708_p10 = pneg %p1012_p8 }
  0x19   : > { %p1024_p11 = pnand %p708_p10, %p989_p1 }
  0x1a   : > { %s149_s26 = sshll.u32 %s1387_s1, 4  ;;  %s150_s26 = int_to_ptr.vmem [resolvable:$true] %s149_s26 }
  0x1b   : > { %s779_s5 = scalar_lea.vmem %s150_s26, 16  ;;  %p781_p13 = pneg %p1024_p11 }
  0x1c   : > { %p780_p12 = scmp.ne.s32.totalorder %s150_s26, %s779_s5  ;;  %p787_p5 = scmp.lt.s32.totalorder %s150_s26, %s150_s26 }
  0x1d   : > { %p788_p7 = scmp.lt.s32.totalorder %s779_s5, %s779_s5 }
  0x1e   : > { %p782_p0 = pnand %p781_p13, %p780_p12 }
  0x1f   : > { %p789_p9 = por %p788_p7, %p787_p5 }
  0x20   : > { %p783_p3 = pneg %p782_p0 }
  0x22   : > { %p790_p6 = pnand %p789_p9, %p783_p3 }
  0x24   : > { %793 = shalt.err (!%p790_p6)
}
  0x25   : > { %s931_s6 = smov [#allocation6]   ;;  %s794_s7 = scalar_lea.vmem %s161_s30, 16 }
  0x26   : > { %711 = dma.vmem_to_smem (!%p1024_p11), %s150_s26, 16, %s931_s6, [#allocation5]  }
  0x27   : > { %p795_p10 = scmp.ne.s32.totalorder %s161_s30, %s794_s7  ;;  %p802_p8 = scmp.lt.s32.totalorder %s161_s30, %s161_s30 }
  0x28   : > { %p803_p2 = scmp.lt.s32.totalorder %s794_s7, %s794_s7 }
  0x29   : > { %p797_p1 = pnand %p795_p10, %p781_p13 }
  0x2a   : > { %p804_p12 = por %p803_p2, %p802_p8 }
  0x2b   : > { %p798_p4 = pneg %p797_p1 }
  0x2d   : > { %p805_p0 = pnand %p804_p12, %p798_p4 }
  0x2f   : > { %808 = shalt.err (!%p805_p0)
}
  0x30   : > { %s932_s8 = smov [#allocation7]   ;;  %s33_s9 = sadd.s32 1, %s925_s16 }
  0x31   : > { %714 = dma.vmem_to_smem (!%p1024_p11), %s161_s30, 16, %s932_s8, [#allocation8]  }
  0x32   : > { %s42_s10 = sadd.s32 1, %s917_s14  ;;  %p35_p1 = scmp.ge.s32.totalorder %s33_s9, 2 }
  0x33   : > { %p49_p2 = scmp.ne.s32.totalorder %s917_s14, %s913_s13  ;;  %p50_p4 = scmp.eq.s32.totalorder %s929_s17, 0 }
  0x34   : > { %p725_p6 = scmp.lt.s32.totalorder %s929_s17, 2  ;;  %s1408_s9 = smov (%p35_p1, %s33_s9), 0 }
  0x35   : > { %p51_p8 = por %p50_p4, %p49_p2  ;;  %p1390_p9 = scmp.ne.s32.totalorder %s1384_s21, 0 }
  0x36   : > { %s37_s18 = ssub.s32 %s925_s16, %s1408_s9  ;;  %s171_s19 = sand.u32 1, %s917_s14  }
  0x37   : > { %p1044_p13 = por %p1390_p9, %p49_p2  ;;  %p40_p3 = scmp.eq.s32.totalorder %s37_s18, 0 }
  0x38   : > { %s617_s24 = sshll.u32 %s171_s19, 3  ;;  %s694_s25 = sshll.u32 %s925_s16, 7 }
  0x39   : > { %s1053_s26 = scalar_select %p40_p3, %s917_s14, %s42_s10  }
  0x3a   : > { %s1392_s0 = sld [smem:[#allocation14_spill]]  ;;  %s175_s21 = scalar_lea.vmem [#allocation2], %s617_s24 }
  0x3b   : > { %s185_s4 = sshll.u32 %s175_s21, 4  ;;  %p1062_p11 = pnand %p725_p6, %p51_p8  ;;  %s1066_s4 = int_to_ptr.vmem [resolvable:$true] %s185_s4 }
  0x3c   : > { %s172_s6 = scalar_lea.sflag [#allocation3], %s171_s19 }
  0x3d   : > { %p811_p7 = pneg %p1062_p11 }
  0x40   : > { %s1058_s30 = scalar_lea.hbm %s1392_s0, %s694_s25  ;;  %s814_s18 = scalar_lea.hbm %s1392_s0, 256 }
  0x41   : > { %s809_s7 = scalar_lea.hbm %s1058_s30, 128  ;;  %p815_p0 = scmp.lt.u32.totalorder %s1058_s30, %s1392_s0 }
  0x42   : > { %p810_p5 = scmp.ne.s32.totalorder %s1058_s30, %s809_s7  ;;  %p816_p1 = scmp.lt.u32.totalorder %s814_s18, %s809_s7 }
  0x43   : > { %p818_p4 = scmp.lt.u32.totalorder %s809_s7, %s1058_s30 }
  0x44   : > { %p812_p10 = pnand %p811_p7, %p810_p5  ;;  %p817_p2 = por %p816_p1, %p815_p0 }
  0x46   : > { %p813_p12 = pneg %p812_p10  ;;  %p819_p6 = por %p818_p4, %p817_p2 }
  0x48   : > { %p820_p8 = pnand %p819_p6, %p813_p12 }
  0x4a   : > { %823 = shalt.err (!%p820_p8)
}
  0x4b   : > { %s824_s19 = scalar_lea.vmem %s1066_s4, 128  ;;  %s933_s28 = smov [#allocation2]  }
  0x4c   : > { %p825_p9 = scmp.ne.s32.totalorder %s1066_s4, %s824_s19  ;;  %s829_s29 = sshll.u32 %s933_s28, 4  ;;  %s830_s29 = int_to_ptr.vmem [resolvable:$false] %s829_s29 }
  0x4d   : > { %s831_s21 = scalar_lea.vmem %s830_s29, 256  ;;  %p832_p10 = scmp.lt.s32.totalorder %s1066_s4, %s830_s29 }
  0x4e   : > { %p827_p3 = pnand %p825_p9, %p811_p7  ;;  %p833_p0 = scmp.lt.s32.totalorder %s831_s21, %s824_s19 }
  0x50   : > { %p828_p5 = pneg %p827_p3  ;;  %p834_p1 = por %p833_p0, %p832_p10 }
  0x52   : > { %p835_p2 = pnand %p834_p1, %p828_p5 }
  0x54   : > { %838 = shalt.err (!%p835_p2)
}
  0x55   : > { %718 = dma.hbm_to_vmem [thread:$0]  (!%p1062_p11), %s1058_s30, 128, %s1066_s4, %s172_s6  }
  0x56   : > { %p1394_p12 = scmp.ne.s32.totalorder %s1388_s27, 0 }
  0x57   : > { %s1096_s7 = sand.u32 (!%p1394_p12), 1, %s913_s13   ;;  %p1395_p7 = scmp.ne.s32.totalorder (!%p1394_p12), %s1385_s22, 0 }
  0x58   : > { %194 = sbr.rel (%p1394_p12) target bundleno = 174 (0xae), region = 32  ;;  %s1380_s8 = sshll.u32 (!%p1394_p12), %s1096_s7, 3 }
  0x59   : > { %s197_s10 = scalar_lea.sflag (!%p1394_p12), [#allocation3], %s1096_s7  ;;  %s200_s18 = scalar_lea.vmem (!%p1394_p12), [#allocation2], %s1380_s8 }
  0x5f   : > { %892 = dma.done.wait (%p1395_p7), %s197_s10, 128  }
  0x60   : > { %894 = vsyncadd (%p1395_p7), %s197_s10, 4294967168  ;;  %p1396_p11 = scmp.ne.s32.totalorder %s1383_s20, 0 }
  0x62   : > { %896 = dma.done.wait (%p1396_p11), [#allocation5], 16  }
  0x63   : > { %898 = vsyncadd (%p1396_p11), [#allocation5], 4294967280 }
  0x64   : > { %900 = dma.done.wait (%p1396_p11), [#allocation8], 16  }
  0x65   : > { %902 = vsyncadd (%p1396_p11), [#allocation8], 4294967280 }
  0x66   : > { %213 = sfence }
  0x67   : > { %s241_s27 = sld [smem:[#allocation6]]  ;;  %v1114_v0 = vld [vmem:[%s200_s18] ss:$4 sm:$0x3]  ;;  %s628_s30 = sld [smem:[#allocation6 + $0x1]] }
  0x68   : > { %s629_s4 = sld [smem:[#allocation6 + $0x2]]  ;;  %s630_s22 = sld [smem:[#allocation6 + $0x3]]  ;;  %v1116_v1 = vld [vmem:[%s200_s18 + $0x1] ss:$4 sm:$0x3] }
  0x69   : > { %s1118_s5 = sld [smem:[#allocation7]]  ;;  %s631_s6 = sld [smem:[#allocation6 + $0x4]]  ;;  %v1120_v2 = vld [vmem:[%s200_s18 + $0x2] ss:$4 sm:$0x3] }
  0x6a   : > { %v1122_v3 = vld [vmem:[%s200_s18 + $0x3] ss:$4 sm:$0x3]  ;;  %s632_s24 = sld [smem:[#allocation6 + $0x5]]  ;;  %s633_s25 = sld [smem:[#allocation6 + $0x6]] }
  0x6b   : > { %s634_s20 = sld [smem:[#allocation6 + $0x7]]  ;;  %s1124_s19 = sld [smem:[#allocation7 + $0x1]] }
  0x6c   : > { %s1127_s28 = sld [smem:[#allocation6 + $0x8]]  ;;  %s1129_s29 = sld [smem:[#allocation6 + $0x9]] }
  0x6d   : > { %v242_v4 = vstv %s241_s27  ;;  %v245_v6 = vstv %s628_s30  ;;  %s1131_s21 = sld [smem:[#allocation6 + $0xa]]  ;;  %s1133_s10 = sld [smem:[#allocation6 + $0xb]] }
  0x6e   : > { %v243_v5 = vmul.f32 %v242_v4, %v1114_v0  ;;  %v246_v7 = vmul.f32 %v1116_v1, %v245_v6  ;;  %v249_v8 = vstv %s629_s4  ;;  %v253_v9 = vstv %s630_s22  ;;  %s1136_s18 = sld [smem:[#allocation6 + $0xc]]  ;;  %s1140_s27 = sld [smem:[#allocation6 + $0xd]] }
  0x6f   : > { %v250_v10 = vmul.f32 %v1120_v2, %v249_v8  ;;  %v254_v11 = vmul.f32 %v1122_v3, %v253_v9  ;;  %v261_v12 = vstv %s631_s6  ;;  %s1142_s30 = sld [smem:[#allocation6 + $0xe]]  ;;  %s1145_s4 = sld [smem:[#allocation7 + $0x2]]  ;;  %v257_v17 = vstv %s1118_s5 }
  0x70   : > { %v247_v13 = vadd.f32 %v246_v7, %v243_v5  ;;  %v262_v14 = vmul.f32 %v261_v12, %v1114_v0  ;;  %v264_v15 = vstv %s632_s24  ;;  %v268_v16 = vstv %s633_s25  ;;  %s1147_s22 = sld [smem:[#allocation6 + $0xf]]  ;;  %s1152_s6 = sld [smem:[#allocation7 + $0x3]] }
  0x71   : > { %v265_v18 = vmul.f32 %v1116_v1, %v264_v15  ;;  %v269_v19 = vmul.f32 %v1120_v2, %v268_v16  ;;  %v272_v20 = vstv %s634_s20  ;;  %s1154_s8 = sld [smem:[#allocation6 + $0x10]]  ;;  %s1159_s24 = sld [smem:[#allocation6 + $0x11]]  ;;  %v276_v30 = vstv %s1124_s19 }
  0x72   : > { %v251_v21 = vadd.f32 %v250_v10, %v247_v13  ;;  %v273_v22 = vmul.f32 %v1122_v3, %v272_v20  ;;  %v280_v23 = vstv %s1127_s28  ;;  %v283_v24 = vstv %s1129_s29  ;;  %s1161_s25 = sld [smem:[#allocation6 + $0x12]]  ;;  %s1166_s5 = sld [smem:[#allocation6 + $0x13]] }
  0x73   : > { %v266_v25 = vadd.f32 %v265_v18, %v262_v14  ;;  %v281_v26 = vmul.f32 %v280_v23, %v1114_v0  ;;  %v284_v27 = vmul.f32 %v1116_v1, %v283_v24  ;;  %v287_v28 = vstv %s1131_s21  ;;  %s1168_s20 = sld [smem:[#allocation7 + $0x4]]  ;;  %s1175_s29 = sld [smem:[#allocation6 + $0x15]] }
  0x74   : > { %v255_v29 = vadd.f32 %v254_v11, %v251_v21  ;;  %v288_v31 = vmul.f32 %v1120_v2, %v287_v28  ;;  %v291_v32 = vstv %s1133_s10  ;;  %s1173_s28 = sld [smem:[#allocation6 + $0x14]]  ;;  %v299_v36 = vstv %s1136_s18  ;;  %s1179_s21 = sld [smem:[#allocation6 + $0x16]] }
  0x75   : > { %v270_v33 = vadd.f32 %v269_v19, %v266_v25  ;;  %v285_v34 = vadd.f32 %v284_v27, %v281_v26  ;;  %v292_v35 = vmul.f32 %v1122_v3, %v291_v32  ;;  %s1181_s0 = sld [smem:[#allocation6 + $0x17]]  ;;  %v300_v38 = vmul.f32 %v299_v36, %v1114_v0  ;;  %s1186_s19 = sld [smem:[#allocation6 + $0x18]] }
  0x76   : > { %v258_v37 = vadd.f32 %v257_v17, %v255_v29  ;;  %v302_v39 = vstv %s1140_s27  ;;  %v306_v40 = vstv %s1142_s30  ;;  %s1188_s10 = sld [smem:[#allocation6 + $0x19]]  ;;  %v295_v46 = vstv %s1145_s4  ;;  %s1195_s18 = sld [smem:[#allocation7 + $0x5]] }
  0x77   : > { %v274_v41 = vadd.f32 %v273_v22, %v270_v33  ;;  %v289_v42 = vadd.f32 %v288_v31, %v285_v34  ;;  %v303_v43 = vmul.f32 %v1116_v1, %v302_v39  ;;  %v307_v44 = vmul.f32 %v1120_v2, %v306_v40  ;;  %s1197_s27 = sld [smem:[#allocation6 + $0x1a]]  ;;  %s1204_s30 = sld [smem:[#allocation6 + $0x1b]] }
  0x78   : > { %v259_v45 = vmax.f32 %v258_v37, 0.0  ;;  %v310_v47 = vstv %s1147_s22  ;;  %v322_v48 = vstv %s1154_s8  ;;  %v314_v53 = vstv %s1152_s6  ;;  %s1207_s8 = sld [smem:[#allocation6 + $0x1c]]  ;;  %s1209_s4 = sld [smem:[#allocation6 + $0x1d]] }
  0x79   : > { %v277_v49 = vadd.f32 %v276_v30, %v274_v41  ;;  %v293_v50 = vadd.f32 %v292_v35, %v289_v42  ;;  %v304_v51 = vadd.f32 %v303_v43, %v300_v38  ;;  %v311_v52 = vmul.f32 %v1122_v3, %v310_v47  ;;  %s1215_s22 = sld [smem:[#allocation6 + $0x1e]]  ;;  %s1261_s1 = sld [smem:[#allocation6 + $0x2b]] }
  0x7a   : > { %v317_v54 = vadd.f32 %v259_v45, %v1114_v0  ;;  %v325_v55 = vstv %s1159_s24  ;;  %v329_v56 = vstv %s1161_s25  ;;  %v333_v60 = vstv %s1166_s5  ;;  %s1221_s6 = sld [smem:[#allocation7 + $0x6]]  ;;  %s1223_s24 = sld [smem:[#allocation6 + $0x1f]] }
  0x7b   : > { %v278_v57 = vmax.f32 %v277_v49, 0.0  ;;  %v296_v58 = vadd.f32 %v295_v46, %v293_v50  ;;  %v308_v59 = vadd.f32 %v307_v44, %v304_v51  ;;  %v337_v62 = vstv %s1168_s20  ;;  %s1228_s25 = sld [smem:[#allocation7 + $0x7]]  ;;  %s1232_s5 = sld [smem:[#allocation6 + $0x21]] }
  0x7c   : > { %v323_v61 = vmul.f32 %v322_v48, %v317_v54  ;;  %v341_v63 = vstv %s1173_s28  ;;  %v344_v4 = vstv %s1175_s29  ;;  %v348_v9 = vstv %s1179_s21  ;;  %s1234_s28 = sld [smem:[#allocation6 + $0x22]]  ;;  %s1237_s29 = sld [smem:[#allocation6 + $0x23]] }
  0x7d   : > { %v297_v5 = vmax.f32 %v296_v58, 0.0  ;;  %v312_v6 = vadd.f32 %v311_v52, %v308_v59  ;;  %v318_v7 = vadd.f32 %v1116_v1, %v278_v57  ;;  %v342_v8 = vmul.f32 %v341_v63, %v317_v54  ;;  %s1239_s21 = sld [smem:[#allocation7 + $0x8]]  ;;  %s1274_s20 = sld [smem:[#allocation6 + $0x2d]] }
  0x7e   : > { %v352_v10 = vstv %s1181_s0  ;;  %v360_v11 = vstv %s1186_s19  ;;  %v363_v12 = vstv %s1188_s10  ;;  %v356_v17 = vstv %s1195_s18  ;;  %s1230_s0 = sld [smem:[#allocation6 + $0x20]]  ;;  %s1244_s19 = sld [smem:[#allocation6 + $0x24]] }
  0x7f   : > { %v315_v13 = vadd.f32 %v314_v53, %v312_v6  ;;  %v319_v14 = vadd.f32 %v1120_v2, %v297_v5  ;;  %v326_v15 = vmul.f32 %v325_v55, %v318_v7  ;;  %v345_v16 = vmul.f32 %v344_v4, %v318_v7  ;;  %s1246_s10 = sld [smem:[#allocation6 + $0x25]]  ;;  %s1248_s18 = sld [smem:[#allocation6 + $0x26]] }
  0x80   : > { %v361_v18 = vmul.f32 %v360_v11, %v317_v54  ;;  %v364_v19 = vmul.f32 %v363_v12, %v318_v7  ;;  %v367_v20 = vstv %s1197_s27  ;;  %v371_v28 = vstv %s1204_s30  ;;  %s1250_s27 = sld [smem:[#allocation6 + $0x27]]  ;;  %s1253_s30 = sld [smem:[#allocation6 + $0x28]] }
  0x81   : > { %v316_v21 = vmax.f32 %v315_v13, 0.0  ;;  %v327_v22 = vadd.f32 %v326_v15, %v323_v61  ;;  %v330_v23 = vmul.f32 %v329_v56, %v319_v14  ;;  %v346_v24 = vadd.f32 %v345_v16, %v342_v8 }
  0x82   : > { %v349_v25 = vmul.f32 %v348_v9, %v319_v14  ;;  %v365_v26 = vadd.f32 %v364_v19, %v361_v18  ;;  %v368_v27 = vmul.f32 %v367_v20, %v319_v14  ;;  %v379_v31 = vstv %s1207_s8  ;;  %s1255_s8 = sld [smem:[#allocation6 + $0x29]] }
  0x83   : > { %v320_v29 = vadd.f32 %v1122_v3, %v316_v21  ;;  %v331_v30 = vadd.f32 %v330_v23, %v327_v22  ;;  %v382_v32 = vstv %s1209_s4  ;;  %v380_v35 = vmul.f32 %v379_v31, %v317_v54  ;;  %s1259_s4 = sld [smem:[#allocation6 + $0x2a]] }
  0x84   : > { %v350_v33 = vadd.f32 %v349_v25, %v346_v24  ;;  %v369_v34 = vadd.f32 %v368_v27, %v365_v26  ;;  %v383_v36 = vmul.f32 %v382_v32, %v318_v7  ;;  %v386_v40 = vstv %s1215_s22  ;;  %s1268_s22 = sld [smem:[#allocation6 + $0x2c]] }
  0x85   : > { %v334_v37 = vmul.f32 %v333_v60, %v320_v29  ;;  %v353_v38 = vmul.f32 %v352_v10, %v320_v29  ;;  %v372_v39 = vmul.f32 %v371_v28, %v320_v29  ;;  %v375_v41 = vstv %s1221_s6  ;;  %s1279_s6 = sld [smem:[#allocation6 + $0x2e]] }
  0x86   : > { %v384_v42 = vadd.f32 %v383_v36, %v380_v35  ;;  %v387_v43 = vmul.f32 %v386_v40, %v319_v14  ;;  %v390_v44 = vstv %s1223_s24  ;;  %v394_v50 = vstv %s1228_s25  ;;  %s1281_s24 = sld [smem:[#allocation6 + $0x2f]]  ;;  %s1286_s25 = sld [smem:[#allocation7 + $0x9]] }
  0x87   : > { %v335_v45 = vadd.f32 %v334_v37, %v331_v30  ;;  %v354_v46 = vadd.f32 %v353_v38, %v350_v33  ;;  %v373_v47 = vadd.f32 %v372_v39, %v369_v34  ;;  %v391_v48 = vmul.f32 %v390_v44, %v320_v29 }
  0x88   : > { %v388_v49 = vadd.f32 %v387_v43, %v384_v42  ;;  %v402_v51 = vstv %s1230_s0  ;;  %v477_v52 = vlaneseq  ;;  %v405_v56 = vstv %s1232_s5  ;;  %s1292_s0 = sld [smem:[#allocation7 + $0xa]]  ;;  %s1399_s5 = sshll.u32 %s1096_s7, 3 }
  0x89   : > { %v338_v53 = vadd.f32 %v337_v62, %v335_v45  ;;  %v357_v54 = vadd.f32 %v356_v17, %v354_v46  ;;  %v376_v55 = vadd.f32 %v375_v41, %v373_v47  ;;  %v409_v58 = vstv %s1234_s28  ;;  %s231_s28 = scalar_lea.vmem [#allocation9], %s1399_s5 }
  0x8a   : > { %v392_v57 = vadd.f32 %v391_v48, %v388_v49  ;;  %v413_v59 = vstv %s1237_s29  ;;  %v417_v60 = vstv %s1239_s21  ;;  %v421_v5 = vstv %s1244_s19  ;;  %s695_s29 = sshll.u32 %s921_s15, 7  ;;  %s505_s21 = sshll.u32 %s231_s28, 4  ;;  %s1323_s21 = int_to_ptr.vmem [resolvable:$true] %s505_s21 }
  0x8b   : > { %v339_v61 = vmax.f32 %v338_v53, 0.0  ;;  %v358_v63 = vmax.f32 %v357_v54, 0.0  ;;  %v377_v4 = vmax.f32 %v376_v55, 0.0  ;;  %v424_v6 = vstv %s1246_s10  ;;  %s489_s15 = scalar_lea.sflag [#allocation4], %s1096_s7 }
  0x8c   : > { %v395_v62 = vadd.f32 %v394_v50, %v392_v57  ;;  %v428_v7 = vstv %s1248_s18  ;;  %v432_v8 = vstv %s1250_s27  ;;  %v440_v12 = vstv %s1253_s30  ;;  %s1321_s18 = scalar_lea.hbm %s1375_s3, %s695_s29  ;;  %s839_s27 = scalar_lea.vmem %s1323_s21, 128 }
  0x8d   : > { %v397_v9 = vadd.f32 %v339_v61, %v1114_v0  ;;  %v398_v10 = vadd.f32 %v1116_v1, %v358_v63  ;;  %v399_v11 = vadd.f32 %v1120_v2, %v377_v4  ;;  %v443_v14 = vstv %s1255_s8  ;;  %p840_p4 = scmp.ne.s32.totalorder %s1323_s21, %s839_s27  ;;  %s934_s30 = smov [#allocation9]  }
  0x8e   : > { %v396_v13 = vmax.f32 %v395_v62, 0.0  ;;  %v447_v15 = vstv %s1259_s4  ;;  %v451_v16 = vstv %s1261_s1  ;;  %v459_v25 = vstv %s1268_s22  ;;  %s1296_s1 = sld [smem:[#allocation7 + $0xb]]  ;;  %s843_s8 = sshll.u32 %s934_s30, 4  ;;  %s844_s8 = int_to_ptr.vmem [resolvable:$false] %s843_s8 }
  0x8f   : > { %v403_v17 = vmul.f32 %v402_v51, %v397_v9  ;;  %v406_v18 = vmul.f32 %v405_v56, %v398_v10  ;;  %v410_v19 = vmul.f32 %v409_v58, %v399_v11  ;;  %v422_v20 = vmul.f32 %v421_v5, %v397_v9  ;;  %p841_p6 = pnand %p840_p4, %p1044_p13  ;;  %s845_s4 = scalar_lea.vmem %s844_s8, 256 }
  0x90   : > { %v400_v0 = vadd.f32 %v1122_v3, %v396_v13  ;;  %v425_v1 = vmul.f32 %v424_v6, %v398_v10  ;;  %v429_v21 = vmul.f32 %v428_v7, %v399_v11  ;;  %v441_v2 = vmul.f32 %v440_v12, %v397_v9  ;;  %p846_p9 = scmp.lt.s32.totalorder %s1323_s21, %s844_s8  ;;  %p847_p3 = scmp.lt.s32.totalorder %s845_s4, %s839_s27 }
  0x91   : > { %v407_v22 = vadd.f32 %v406_v18, %v403_v17  ;;  %v444_v23 = vmul.f32 %v443_v14, %v398_v10  ;;  %v448_v24 = vmul.f32 %v447_v15, %v399_v11  ;;  %v460_v31 = vmul.f32 %v459_v25, %v397_v9  ;;  %p842_p8 = pneg %p841_p6 }
  0x92   : > { %v414_v26 = vmul.f32 %v413_v59, %v400_v0  ;;  %v426_v27 = vadd.f32 %v425_v1, %v422_v20  ;;  %v433_v28 = vmul.f32 %v432_v8, %v400_v0  ;;  %v452_v29 = vmul.f32 %v451_v16, %v400_v0  ;;  %p848_p5 = por %p847_p3, %p846_p9 }
  0x93   : > { %v411_v30 = vadd.f32 %v410_v19, %v407_v22  ;;  %v445_v3 = vadd.f32 %v444_v23, %v441_v2  ;;  %v462_v32 = vstv %s1274_s20  ;;  %v466_v35 = vstv %s1279_s6 }
  0x94   : > { %v430_v33 = vadd.f32 %v429_v21, %v426_v27  ;;  %v463_v34 = vmul.f32 %v462_v32, %v398_v10  ;;  %v470_v36 = vstv %s1281_s24  ;;  %v436_v38 = vstv %s1286_s25  ;;  %p849_p10 = pnand %p848_p5, %p842_p8 }
  0x95   : > { %v415_v37 = vadd.f32 %v414_v26, %v411_v30  ;;  %v449_v39 = vadd.f32 %v448_v24, %v445_v3  ;;  %v467_v40 = vmul.f32 %v466_v35, %v399_v11  ;;  %v455_v42 = vstv %s1292_s0 }
  0x96   : > { %v434_v41 = vadd.f32 %v433_v28, %v430_v33  ;;  %v464_v43 = vadd.f32 %v463_v34, %v460_v31  ;;  %v471_v44 = vmul.f32 %v470_v36, %v400_v0  ;;  %vm1304_vm0 = vcmp.lt.s32.totalorder %v477_v52, 256 }
  0x97   : > { %v418_v45 = vadd.f32 %v417_v60, %v415_v37  ;;  %v453_v46 = vadd.f32 %v452_v29, %v449_v39  ;;  %v474_v53 = vstv %s1296_s1 }
  0x98   : > { %v437_v48 = vadd.f32 %v436_v38, %v434_v41  ;;  %v468_v49 = vadd.f32 %v467_v40, %v464_v43 }
  0x99   : > { %v419_v50 = vmax.f32 %v418_v45, 0.0  ;;  %v456_v51 = vadd.f32 %v455_v42, %v453_v46 }
  0x9a   : > { %v438_v54 = vmax.f32 %v437_v48, 0.0  ;;  %v472_v55 = vadd.f32 %v471_v44, %v468_v49 }
  0x9b   : > { %481 = vst.msk [vmem:[%s231_s28] ss:$4 sm:$0x3] %vm1304_vm0, %v419_v50  ;;  %v457_v56 = vmax.f32 %v456_v51, 0.0 }
  0x9c   : > { %686 = vst.msk [vmem:[%s231_s28 + $0x1] ss:$4 sm:$0x3] %vm1304_vm0, %v438_v54  ;;  %v475_v52 = vadd.f32 %v474_v53, %v472_v55 }
  0x9d   : > { %687 = vst.msk [vmem:[%s231_s28 + $0x2] ss:$4 sm:$0x3] %vm1304_vm0, %v457_v56 }
  0x9e   : > { %v476_v57 = vmax.f32 %v475_v52, 0.0 }
  0xa0   : > { %688 = vst.msk [vmem:[%s231_s28 + $0x3] ss:$4 sm:$0x3] %vm1304_vm0, %v476_v57 }
  0xa1   : > { %852 = shalt.err (!%p849_p10)
}
  0xa2   : > { %s853_s7 = scalar_lea.hbm %s1321_s18, 128  ;;  %s857_s6 = scalar_lea.hbm %s1375_s3, 256 }
  0xa3   : > { %p854_p0 = scmp.ne.s32.totalorder %s1321_s18, %s853_s7  ;;  %p858_p12 = scmp.lt.u32.totalorder %s1321_s18, %s1375_s3 }
  0xa4   : > { %p859_p7 = scmp.lt.u32.totalorder %s857_s6, %s853_s7  ;;  %p861_p4 = scmp.lt.u32.totalorder %s853_s7, %s1321_s18 }
  0xa5   : > { %p855_p1 = pnand %p854_p0, %p1044_p13 }
  0xa6   : > { %p860_p11 = por %p859_p7, %p858_p12 }
  0xa7   : > { %p856_p2 = pneg %p855_p1 }
  0xa8   : > { %p862_p6 = por %p861_p4, %p860_p11 }
  0xaa   : > { %p863_p8 = pnand %p862_p6, %p856_p2 }
  0xac   : > { %866 = shalt.err (!%p863_p8)
}
  0xad   : > { %706 = dma.vmem_to_hbm [thread:$0]  (%p1044_p13), %s1323_s21, 128, %s1321_s18, %s489_s15  }
  0xae PF: > { %s517_s0 = sand.u32 1, %s909_s12   ;;  %p1400_p9 = scmp.ne.s32.totalorder %s1386_s23, 0 }
  0xaf   : > { %p1401_p3 = scmp.ge.s32.totalorder %s929_s17, 2  ;;  %s518_s1 = scalar_lea.sflag [#allocation4], %s517_s0 }
  0xb1   : > { %p720_p5 = pnand %p1401_p3, %p1400_p9 }
  0xb3   : > { %904 = dma.done.wait (!%p720_p5), %s518_s1, 128  }
  0xb4   : > { %906 = vsyncadd (!%p720_p5), %s518_s1, 4294967168  ;;  %s21_s17 = sadd.s32 1, %s929_s17   ;;  %s1402_s12 = smov %s913_s13 }
  0xb5   : > { %p18_p10 = scmp.ge.s32.totalorder %s21_s17, 4   ;;  %s1403_s13 = smov %s917_s14 }
  0xb6   : > { %s1404_s14 = smov %s1053_s26  ;;  %s1405_s15 = smov %s925_s16 }
  0xb7   : > { %s1406_s16 = smov %s1408_s9  ;;  %20 = sbr.rel (!%p18_p10) target bundleno = 11 (0xb), region = 92 }
  0xbe   :  { %523 = vsyncpa [#allocation3], 1 }
  0xbf   :  { %525 = vsyncpa [#allocation3 + $0x1], 1 }
  0xc0   :  { %526 = vsyncpa [#allocation4], 1 }
  0xc1   :  { %528 = vsyncpa [#allocation4 + $0x1], 1 }
  0xc2   :  { %529 = vsyncpa [#allocation5], 1 }
  0xc3   :  { %531 = vsyncpa [#allocation5 + $0x1], 1 }
  0xc4   :  { %532 = vsyncpa [#allocation8], 1 }

</bundles_post_ra>
